<compile_context>
chip_gen: v7x
topology: tpu7x:2x2x1
jax: 0.10.0
libtpu: 0.0.40
codegen_flags: <defaults>
</compile_context>

<pallas_src>
import jax
import jax.numpy as jnp
from jax.experimental import pallas as pl
from jax.experimental.pallas import tpu as pltpu


def _linear_kernel(wb_ref, x_ref, o_ref):
    # wb_ref : (2,) f32 in SMEM -> [weight, bias]
    # x_ref  : (tile_rows, lanes) tile of the lane-dense input slab (VMEM)
    # o_ref  : (tile_rows, lanes) tile of the lane-dense output slab (VMEM)
    w = wb_ref[0]
    b = wb_ref[1]
    xv = x_ref[...].astype(jnp.float32)          # in-kernel upcast (free VPU slot)
    o_ref[...] = (xv * w + b).astype(o_ref.dtype)  # VPU broadcast fma, full-lane store


def linear_forward(x, weight, bias):
    """y = x @ weight.T + bias  (PyTorch nn.Linear(1, 1) semantics).

    x:      (N, 1) float
    weight: (1, 1) float
    bias:   (1,)   float
    returns (N, 1) float32 (or x.dtype if floating)
    """
    n, k = x.shape
    m = weight.shape[0]
    assert k == 1 and m == 1 and weight.shape == (1, 1), (
        "kernel is specialized to nn.Linear(1, 1)"
    )

    out_dtype = x.dtype if jnp.issubdtype(x.dtype, jnp.floating) else jnp.float32

    # Pack weight & bias into a single flat f32 SMEM scalar array (one descriptor).
    wb = jnp.concatenate(
        [weight.reshape(1), bias.reshape(1)]).astype(jnp.float32)

    # ---- lane-dense layout plumbing (pure layout, not math) -------------------
    lanes = 1024 if n >= 1024 else 128
    xf = x.reshape(-1)                       # (N,)  -- metadata-only reshape
    n_pad = pl.cdiv(n, lanes) * lanes
    if n_pad != n:
        xf = jnp.pad(xf, (0, n_pad - n))     # tiny tail pad; sliced off after
    rows = n_pad // lanes
    x2d = xf.reshape(rows, lanes)            # lane-dense slab

    # (512, 1024) f32 tile = 2 MiB per buffer; double-buffered in+out ~= 8 MiB,
    # fits v5e's 16 MiB / v6e's 32 MiB / v7x's 32 MiB default scoped VMEM.
    tile_rows = 512 if rows >= 512 else rows
    grid = (pl.cdiv(rows, tile_rows),)       # Pallas clips a partial last block

    y2d = pl.pallas_call(
        _linear_kernel,
        out_shape=jax.ShapeDtypeStruct((rows, lanes), out_dtype),
        grid=grid,
        in_specs=[
            pl.BlockSpec(memory_space=pltpu.MemorySpace.SMEM),   # packed [w, b]
            pl.BlockSpec((tile_rows, lanes), lambda i: (i, 0)),  # x tile
        ],
        out_specs=pl.BlockSpec((tile_rows, lanes), lambda i: (i, 0)),
        compiler_params=pltpu.CompilerParams(
            dimension_semantics=("parallel",),   # shards rows across v7x's 2 TCs
        ),
        cost_estimate=pl.CostEstimate(
            flops=2 * n_pad,
            transcendentals=0,
            bytes_accessed=(x2d.dtype.itemsize * n_pad
                            + jnp.dtype(out_dtype).itemsize * n_pad + 8),
        ),
    )(wb, x2d)

    # Undo the layout plumbing: slab -> (N, 1).
    return y2d.reshape(-1)[:n].reshape(n, m)


if __name__ == "__main__":
    # Deterministic parameter init matching nn.Linear(1, 1) shapes:
    # weight (1, 1), bias (1,), uniform(-1/sqrt(in_features), +1/sqrt(in_features)).
    key = jax.random.PRNGKey(0)
    k_w, k_b, k_x = jax.random.split(key, 3)
    bound = 1.0  # 1 / sqrt(in_features=1)
    weight = jax.random.uniform(k_w, (1, 1), jnp.float32, -bound, bound)
    bias = jax.random.uniform(k_b, (1,), jnp.float32, -bound, bound)

    # Input matching the PyTorch script: x = FloatTensor(range(5)).unsqueeze(1)
    x = jnp.arange(5, dtype=jnp.float32).reshape(5, 1)

    y = linear_forward(x, weight, bias)
    jax.block_until_ready(y)

    y_ref = x @ weight.T + bias
    assert y.shape == (5, 1)
    assert jnp.allclose(y, y_ref, atol=1e-5), (y, y_ref)

    # Second small check exercising the padded lane-dense path (N not a
    # multiple of the lane width).
    x2 = jax.random.uniform(k_x, (300, 1), jnp.float32, -3.0, 3.0)
    y2 = linear_forward(x2, weight, bias)
    jax.block_until_ready(y2)
    y2_ref = x2 @ weight.T + bias
    assert y2.shape == (300, 1)
    assert jnp.allclose(y2, y2_ref, atol=1e-5)

    print("KERNEL_OK")
</pallas_src>

<mosaic_0001>
module attributes {stable_mosaic.version = 11 : i64} {
  func.func @_linear_kernel(%arg0: i32, %arg1: memref<2xf32, #tpu.memory_space<smem>>, %arg2: memref<1x128xf32, #tpu.memory_space<vmem>>, %arg3: memref<1x128xf32, #tpu.memory_space<vmem>>) attributes {dimension_semantics = [#tpu.dimension_semantics<parallel>], iteration_bounds = array<i64: 1>, scalar_prefetch = 0 : i64, scratch_operands = 0 : i64, tpu.core_type = #tpu.core_type<tc>, window_params = [{transform_indices = @transform_0, window_bounds = array<i64: 2>}, {transform_indices = @transform_1, window_bounds = array<i64: 1, 128>}, {transform_indices = @transform_2, window_bounds = array<i64: 1, 128>}]} {
    %c0 = arith.constant 0 : index
    %0 = memref.load %arg1[%c0] : memref<2xf32, #tpu.memory_space<smem>>
    %c1 = arith.constant 1 : index
    %1 = memref.load %arg1[%c1] : memref<2xf32, #tpu.memory_space<smem>>
    %c0_0 = arith.constant 0 : index
    %c0_1 = arith.constant 0 : index
    %2 = vector.load %arg2[%c0_0, %c0_1] : memref<1x128xf32, #tpu.memory_space<vmem>>, vector<1x128xf32>
    %3 = vector.broadcast %0 : f32 to vector<1x128xf32>
    %4 = arith.mulf %2, %3 : vector<1x128xf32>
    %5 = vector.broadcast %1 : f32 to vector<1x128xf32>
    %6 = arith.addf %4, %5 : vector<1x128xf32>
    %c0_2 = arith.constant 0 : index
    %c0_3 = arith.constant 0 : index
    %7 = vector.load %arg3[%c0_2, %c0_3] : memref<1x128xf32, #tpu.memory_space<vmem>>, vector<1x128xf32>
    tpu.vector_store %arg3[%c0_2, %c0_3], %6 {strides = array<i32>} : memref<1x128xf32, #tpu.memory_space<vmem>>, vector<1x128xf32>,
    return
  }
  func.func @transform_0(%arg0: i32) -> i32 {
    %c0_i32 = arith.constant 0 : i32
    %c0_i32_0 = arith.constant 0 : i32
    return %c0_i32 : i32
  }
  func.func @transform_1(%arg0: i32) -> (i32, i32) {
    %c0_i32 = arith.constant 0 : i32
    %c0_i32_0 = arith.constant 0 : i32
    return %arg0, %c0_i32 : i32, i32
  }
  func.func @transform_2(%arg0: i32) -> (i32, i32) {
    %c0_i32 = arith.constant 0 : i32
    %c0_i32_0 = arith.constant 0 : i32
    return %arg0, %c0_i32 : i32, i32
  }
}

</mosaic_0001>

<bundles_post_ra>
// kernel: tpu_custom_call.1
= control target key start
LH: loop header
LB: loop body
LE: loop exit
PB: predicated region body
PF: predicated region fallthrough
CT: control target
= control target key end

     0   :  { %7 = vsyncpa [#allocation4], 0  ;;  %s129_s0 = inlined_call_operand.hbm [shape: f32[2], index: 0, kind: input, shape index: {}]   ;;  %s130_s1 = inlined_call_operand.vmem [shape: f32[1,128], index: 1, kind: input, shape index: {}]   ;;  %s131_s2 = inlined_call_operand.hbm [shape: f32[1,128], index: 2, kind: output, shape index: {}]  }
   0x1   :  { %8 = vsyncpa [#allocation3], 0  ;;  %s49_s11 = scalar_lea.hbm %s129_s0, 16 }
   0x2   :  { %p50_p0 = scmp.ne.s32.totalorder %s129_s0, %s49_s11  ;;  %p53_p1 = scmp.lt.u32.totalorder %s49_s11, %s129_s0 }
   0x4   :  { %p55_p2 = pnand %p53_p1, %p50_p0 }
   0x6   :  { %58 = shalt.err (!%p55_p2)
}
   0x7   :  { %s85_s16 = smov [#allocation2]  }
   0x8   :  { %16 = dma.hbm_to_smem %s129_s0, 16, %s85_s16, [#allocation4]  }
   0x9   :  { %81 = dma.done.wait [#allocation4], 16  }
   0xa   :  { %82 = vsyncadd [#allocation4], 4294967280 }
   0xb   :  { %22 = sfence }
   0xc   :  { %s23_s19 = sld [smem:[#allocation2]]  ;;  %s46_s20 = sld [smem:[#allocation2 + $0x1]]  ;;  %v25_v0 = vld [vmem:[%s130_s1] sm:$0x1] }
   0xd   :  { %s86_s23 = smov [#allocation5]  }
   0xe   :  { %s37_s24 = sshll.u32 %s86_s23, 4  ;;  %s38_s24 = int_to_ptr.vmem [resolvable:$true] %s37_s24 }
   0xf   :  { %s59_s25 = scalar_lea.vmem %s38_s24, 16  ;;  %s63_s0 = scalar_lea.vmem %s38_s24, 32 }
  0x10   :  { %p60_p3 = scmp.ne.s32.totalorder %s38_s24, %s59_s25  ;;  %p64_p4 = scmp.lt.s32.totalorder %s38_s24, %s38_s24 }
  0x11   :  { %p65_p5 = scmp.lt.s32.totalorder %s63_s0, %s59_s25 }
  0x12   :  { %v26_v1 = vstv %s23_s19  ;;  %v28_v2 = vstv %s46_s20 }
  0x13   :  { %v27_v3 = vmul.f32 %v26_v1, %v25_v0  ;;  %p66_p6 = por %p65_p5, %p64_p4 }
  0x15   :  { %v29_v4 = vadd.f32 %v28_v2, %v27_v3  ;;  %p67_p7 = pnand %p66_p6, %p60_p3 }
  0x17   :  { %30 = vst [vmem:[#allocation5] sm:$0x1] %v29_v4 }
  0x18   :  { %70 = shalt.err (!%p67_p7)
}
  0x19   :  { %s71_s1 = scalar_lea.hbm %s131_s2, 16 }
  0x1a   :  { %p72_p8 = scmp.ne.s32.totalorder %s131_s2, %s71_s1  ;;  %p75_p9 = scmp.lt.u32.totalorder %s71_s1, %s131_s2 }
  0x1c   :  { %p77_p10 = pnand %p75_p9, %p72_p8 }
  0x1e   :  { %80 = shalt.err (!%p77_p10)
}
  0x1f   :  { %40 = dma.vmem_to_hbm [thread:$0]  %s38_s24, 16, %s131_s2, [#allocation3]  }
  0x20   :  { %83 = dma.done.wait [#allocation3], 16  }
  0x21   :  { %84 = vsyncadd [#allocation3], 4294967280 }
  0x22   :  { %44 = vsyncpa [#allocation3], 1 }
  0x23   :  { %45 = vsyncpa [#allocation4], 1 }

</bundles_post_ra>
